<compile_context>
chip_gen: v7x
topology: tpu7x:2x2x1
jax: 0.10.0
libtpu: 0.0.40
codegen_flags: <defaults>
</compile_context>

<pallas_src>
import math

import jax
import jax.numpy as jnp
from jax.experimental import pallas as pl
from jax.experimental.pallas import tpu as pltpu

# Small GPT-2-style config (matches the (B, T, C) convention of the model).
B, T, C = 2, 8, 32
HIDDEN = 4 * C          # 128 -> exactly one lane-width, lane-dense intermediate


def _gelu_tanh(x):
    c = math.sqrt(2.0 / math.pi)
    return 0.5 * x * (1.0 + jnp.tanh(c * (x + 0.044715 * x * x * x)))


def mlp_kernel(x_ref, wfc_ref, bfc_ref, wproj_ref, bproj_ref, o_ref):
    # x_ref: (B*T, C) whole-slab in VMEM; weights/biases whole-array in VMEM.
    x = x_ref[...].astype(jnp.float32)                                   # (N, C)

    # c_fc: (N, C) @ (C, 4C) + (1, 4C)  -> lane-dense (N, 128)
    h = jnp.dot(x, wfc_ref[...], preferred_element_type=jnp.float32) + bfc_ref[...]
    h = _gelu_tanh(h)

    # c_proj: (N, 4C) @ (4C, C) + (1, C)
    y = jnp.dot(h, wproj_ref[...], preferred_element_type=jnp.float32) + bproj_ref[...]

    o_ref[...] = y.astype(o_ref.dtype)                                   # one contiguous store


def mlp(x, wfc, bfc, wproj, bproj):
    """x: (B, T, C). Weights stored as (in, out); equivalent to PyTorch y = x @ W.T + b."""
    Bx, Tx, Cx = x.shape
    N = Bx * Tx
    Hd = wfc.shape[1]
    x2 = x.reshape(N, Cx)                      # fold batch+seq into matmul M-dim

    flops = 2 * N * Cx * Hd + 2 * N * Hd * Cx
    transcendentals = N * Hd                   # one tanh per hidden element
    bytes_accessed = 4 * (x2.size + wfc.size + bfc.size + wproj.size + bproj.size + N * Cx)

    vmem = pl.BlockSpec(memory_space=pltpu.MemorySpace.VMEM)
    out = pl.pallas_call(
        mlp_kernel,
        out_shape=jax.ShapeDtypeStruct((N, Cx), x.dtype),
        in_specs=[vmem, vmem, vmem, vmem, vmem],
        out_specs=vmem,
        cost_estimate=pl.CostEstimate(
            flops=flops,
            transcendentals=transcendentals,
            bytes_accessed=bytes_accessed,
        ),
    )(x2, wfc, bfc, wproj, bproj)
    return out.reshape(Bx, Tx, Cx)
    # TODO(synk): for real GPT-2 shapes (C=768, T=1024) reintroduce a grid that
    # tiles the row dim (and the 4C dim of wfc/wproj) and, on v7x, a 2-wide
    # "parallel" leading axis so both TensorCores get work.


def reference_mlp(x, wfc, bfc, wproj, bproj):
    h = _gelu_tanh(x @ wfc + bfc[0])
    return h @ wproj + bproj[0]


if __name__ == "__main__":
    key = jax.random.PRNGKey(0)
    keys = jax.random.split(key, 4)

    x = jax.random.normal(keys[0], (B, T, C), dtype=jnp.float32)

    # Deterministic GPT-2-style init: N(0, 0.02) weights, zero biases.
    wfc = 0.02 * jax.random.normal(keys[1], (C, HIDDEN), jnp.float32)
    bfc = jnp.zeros((1, HIDDEN), jnp.float32)
    wproj = 0.02 * jax.random.normal(keys[2], (HIDDEN, C), jnp.float32)
    bproj = jnp.zeros((1, C), jnp.float32)

    out = mlp(x, wfc, bfc, wproj, bproj)
    out = jax.block_until_ready(out)

    ref = reference_mlp(x, wfc, bfc, wproj, bproj)
    assert jnp.allclose(out, ref, atol=1e-4, rtol=1e-4), "mismatch vs reference"

    print("KERNEL_OK")
</pallas_src>

<mosaic_0001>
module attributes {stable_mosaic.version = 11 : i64} {
  func.func @mlp_kernel(%arg0: memref<16x32xf32, #tpu.memory_space<vmem>>, %arg1: memref<32x128xf32, #tpu.memory_space<vmem>>, %arg2: memref<1x128xf32, #tpu.memory_space<vmem>>, %arg3: memref<128x32xf32, #tpu.memory_space<vmem>>, %arg4: memref<1x32xf32, #tpu.memory_space<vmem>>, %arg5: memref<16x32xf32, #tpu.memory_space<vmem>>) attributes {dimension_semantics = [], scalar_prefetch = 0 : i64, scratch_operands = 0 : i64, tpu.core_type = #tpu.core_type<tc>} {
    %c0 = arith.constant 0 : index
    %c0_0 = arith.constant 0 : index
    %0 = vector.load %arg0[%c0, %c0_0] : memref<16x32xf32, #tpu.memory_space<vmem>>, vector<16x32xf32>
    %c0_1 = arith.constant 0 : index
    %c0_2 = arith.constant 0 : index
    %1 = vector.load %arg1[%c0_1, %c0_2] : memref<32x128xf32, #tpu.memory_space<vmem>>, vector<32x128xf32>
    %cst = arith.constant dense<0.000000e+00> : vector<16x128xf32>
    %2 = tpu.matmul %0, %1, %cst {dimension_numbers = #tpu.dot_dimension_numbers<[1], [0], [0], [1], [0, 0, 1, 1], [], []>} : vector<16x32xf32>, vector<32x128xf32>, vector<16x128xf32> -> vector<16x128xf32>
    %c0_3 = arith.constant 0 : index
    %c0_4 = arith.constant 0 : index
    %3 = vector.load %arg2[%c0_3, %c0_4] : memref<1x128xf32, #tpu.memory_space<vmem>>, vector<1x128xf32>
    %4 = vector.broadcast %3 : vector<1x128xf32> to vector<16x128xf32>
    %5 = arith.addf %2, %4 : vector<16x128xf32>
    %cst_5 = arith.constant 5.000000e-01 : f32
    %6 = vector.broadcast %cst_5 : f32 to vector<16x128xf32>
    %7 = arith.mulf %6, %5 : vector<16x128xf32>
    %cst_6 = arith.constant 4.471500e-02 : f32
    %8 = vector.broadcast %cst_6 : f32 to vector<16x128xf32>
    %9 = arith.mulf %8, %5 : vector<16x128xf32>
    %10 = arith.mulf %9, %5 : vector<16x128xf32>
    %11 = arith.mulf %10, %5 : vector<16x128xf32>
    %12 = arith.addf %5, %11 : vector<16x128xf32>
    %cst_7 = arith.constant 0.797884583 : f32
    %13 = vector.broadcast %cst_7 : f32 to vector<16x128xf32>
    %14 = arith.mulf %13, %12 : vector<16x128xf32>
    %15 = math.tanh %14 : vector<16x128xf32>
    %cst_8 = arith.constant 1.000000e+00 : f32
    %16 = vector.broadcast %cst_8 : f32 to vector<16x128xf32>
    %17 = arith.addf %16, %15 : vector<16x128xf32>
    %18 = arith.mulf %7, %17 : vector<16x128xf32>
    %c0_9 = arith.constant 0 : index
    %c0_10 = arith.constant 0 : index
    %19 = vector.load %arg3[%c0_9, %c0_10] : memref<128x32xf32, #tpu.memory_space<vmem>>, vector<128x32xf32>
    %cst_11 = arith.constant dense<0.000000e+00> : vector<16x32xf32>
    %20 = tpu.matmul %18, %19, %cst_11 {dimension_numbers = #tpu.dot_dimension_numbers<[1], [0], [0], [1], [0, 0, 1, 1], [], []>} : vector<16x128xf32>, vector<128x32xf32>, vector<16x32xf32> -> vector<16x32xf32>
    %c0_12 = arith.constant 0 : index
    %c0_13 = arith.constant 0 : index
    %21 = vector.load %arg4[%c0_12, %c0_13] : memref<1x32xf32, #tpu.memory_space<vmem>>, vector<1x32xf32>
    %22 = vector.broadcast %21 : vector<1x32xf32> to vector<16x32xf32>
    %23 = arith.addf %20, %22 : vector<16x32xf32>
    %c0_14 = arith.constant 0 : index
    %c0_15 = arith.constant 0 : index
    %24 = vector.load %arg5[%c0_14, %c0_15] : memref<16x32xf32, #tpu.memory_space<vmem>>, vector<16x32xf32>
    tpu.vector_store %arg5[%c0_14, %c0_15], %23 {strides = array<i32>} : memref<16x32xf32, #tpu.memory_space<vmem>>, vector<16x32xf32>,
    return
  }
}

</mosaic_0001>

<bundles_post_ra>
// kernel: tpu_custom_call.1
= control target key start
LH: loop header
LB: loop body
LE: loop exit
PB: predicated region body
PF: predicated region fallthrough
CT: control target
= control target key end

     0   :  { %vm34_vm0 = vcmask 261120   ;;  %s516_s0 = inlined_call_operand.vmem [shape: f32[16,32], index: 0, kind: input, shape index: {}]   ;;  %s517_s1 = inlined_call_operand.vmem [shape: f32[32,128], index: 1, kind: input, shape index: {}]   ;;  %s518_s2 = inlined_call_operand.vmem [shape: f32[1,128], index: 2, kind: input, shape index: {}]   ;;  %s519_s3 = inlined_call_operand.vmem [shape: f32[128,32], index: 3, kind: input, shape index: {}]   ;;  %s520_s4 = inlined_call_operand.vmem [shape: f32[1,32], index: 4, kind: input, shape index: {}]   ;;  %s521_s5 = inlined_call_operand.hbm [shape: f32[16,32], index: 5, kind: output, shape index: {}]  }
   0x1   :  { %v23_v0 = vld [vmem:[%s517_s1] sm:$0xff]  ;;  %v24_v1 = vld [vmem:[%s517_s1 + $0x8] sm:$0xff]  ;;  %v25_v2 = vld [vmem:[%s517_s1 + $0x10] sm:$0xff] }
   0x2   :  { %v324_v3 = vpack.c.bf16 %v24_v1, %v23_v0  ;;  %v26_v4 = vld [vmem:[%s517_s1 + $0x18] sm:$0xff]  ;;  %v21_v5 = vld [vmem:[%s516_s0] sm:$0xff]  ;;  %v135_v8 = vld [vmem:[%s519_s3 + $0x8] sm:$0xff] }
   0x3   :  { %v328_v6 = vpack.c.bf16 %v26_v4, %v25_v2  ;;  %286 = vmatprep.mubr.msk.f32.mxu0 %vm34_vm0, %v21_v5  ;;  %v134_v7 = vld [vmem:[%s519_s3] sm:$0xff] }
   0x4   :  { %10 = vsyncpa [#allocation3], 0  ;;  %325 = vmatprep.subr.bf16.mxu0 %v324_v3  ;;  %v332_v9 = vpack.c.bf16 %v135_v8, %v134_v7  ;;  %v22_v10 = vld [vmem:[%s516_s0 + $0x8] sm:$0xff]  ;;  %v136_v11 = vld [vmem:[%s519_s3 + $0x10] sm:$0xff]  ;;  %s395_s11 = smov [#allocation2]  }
   0x5   :  { %327 = vmatpush3.bf16.msra.mxu0 %v324_v3  ;;  %v137_v12 = vld [vmem:[%s519_s3 + $0x18] sm:$0xff]  ;;  %v138_v14 = vld [vmem:[%s519_s3 + $0x20] sm:$0xff]  ;;  %v139_v15 = vld [vmem:[%s519_s3 + $0x28] sm:$0xff]  ;;  %s239_s12 = sshll.u32 %s395_s11, 4  ;;  %s240_s12 = int_to_ptr.vmem [resolvable:$true] %s239_s12 }
   0x6   :  { %329 = vmatprep.subr.bf16.mxu0 %v328_v6  ;;  %333 = vmatprep.subr.bf16.mxu1 %v332_v9  ;;  %v336_v13 = vpack.c.bf16 %v137_v12, %v136_v11  ;;  %v340_v16 = vpack.c.bf16 %v139_v15, %v138_v14  ;;  %v140_v17 = vld [vmem:[%s519_s3 + $0x30] sm:$0xff]  ;;  %v141_v18 = vld [vmem:[%s519_s3 + $0x38] sm:$0xff]  ;;  %v142_v19 = vld [vmem:[%s519_s3 + $0x40] sm:$0xff]  ;;  %s371_s13 = scalar_lea.vmem %s240_s12, 256  ;;  %p376_p1 = scmp.lt.s32.totalorder %s240_s12, %s240_s12 }
   0x7   :  { %335 = vmatpush3.bf16.msra.mxu1 %v332_v9  ;;  %v344_v20 = vpack.c.bf16 %v141_v18, %v140_v17  ;;  %v143_v21 = vld [vmem:[%s519_s3 + $0x48] sm:$0xff]  ;;  %v144_v23 = vld [vmem:[%s519_s3 + $0x50] sm:$0xff]  ;;  %v145_v24 = vld [vmem:[%s519_s3 + $0x58] sm:$0xff]  ;;  %p372_p0 = scmp.ne.s32.totalorder %s240_s12, %s371_s13  ;;  %p377_p2 = scmp.lt.s32.totalorder %s371_s13, %s371_s13 }
   0x8   :  { %337 = vmatprep.subr.bf16.mxu1 %v336_v13  ;;  %v348_v22 = vpack.c.bf16 %v143_v21, %v142_v19  ;;  %v352_v25 = vpack.c.bf16 %v145_v24, %v144_v23  ;;  %v146_v26 = vld [vmem:[%s519_s3 + $0x60] sm:$0xff]  ;;  %v147_v27 = vld [vmem:[%s519_s3 + $0x68] sm:$0xff]  ;;  %v148_v29 = vld [vmem:[%s519_s3 + $0x70] sm:$0xff] }
   0x9   :  { %331 = vmatpush3.bf16.msra.mxu0 %v328_v6  ;;  %v356_v28 = vpack.c.bf16 %v147_v27, %v146_v26  ;;  %v149_v30 = vld [vmem:[%s519_s3 + $0x78] sm:$0xff]  ;;  %v250_v32 = vld [vmem:[%s518_s2] ss:$0 sm:$0xff]  ;;  %p378_p3 = por %p377_p2, %p376_p1 }
   0xa   :  { %v360_v31 = vpack.c.bf16 %v149_v30, %v148_v29  ;;  %v253_v55 = vld [vmem:[%s520_s4] ss:$0 sm:$0xff] }
   0xb   :  { %339 = vmatpush3.bf16.msra.mxu1 %v336_v13  ;;  %p379_p4 = pnand %p378_p3, %p372_p0 }
   0xc   :  { %287 = vmatmul.mubr.msk.f32.vlgmr.msra.gmra.mrb[0].mxu0 %vm34_vm0, %v22_v10  ;;  %341 = vmatprep.subr.bf16.mxu1 %v340_v16 }
   0xf   :  { %343 = vmatpush3.bf16.msra.mxu1 %v340_v16 }
  0x10   :  { %345 = vmatprep.subr.bf16.mxu1 %v344_v20 }
  0x13   :  { %347 = vmatpush3.bf16.msra.mxu1 %v344_v20 }
  0x14   :  { %349 = vmatprep.subr.bf16.mxu1 %v348_v22 }
  0x17   :  { %351 = vmatpush3.bf16.msra.mxu1 %v348_v22 }
  0x18   :  { %353 = vmatprep.subr.bf16.mxu1 %v352_v25 }
  0x1b   :  { %355 = vmatpush3.bf16.msra.mxu1 %v352_v25 }
  0x1c   :  { %357 = vmatprep.subr.bf16.mxu1 %v356_v28 }
  0x1f   :  { %359 = vmatpush3.bf16.msra.mxu1 %v356_v28 }
  0x20   :  { %361 = vmatprep.subr.bf16.mxu1 %v360_v31 }
  0x23   :  { %363 = vmatpush3.bf16.msra.mxu1 %v360_v31 }
  0xdf   :  { %v288_v33 = vpop.f32.mrb[0].mxu0 }
  0xe0   :  { %v113_v34 = vadd.f32 %v288_v33, %v250_v32  ;;  %v107_v35 = vpop.f32.mrb[1].mxu0 }
  0xe1   :  { %v108_v36 = vadd.f32 %v250_v32, %v107_v35 }
  0xe2   :  { %v119_v37 = vmul.f32 0.044715, %v113_v34  ;;  %v117_v52 = vmul.f32 0.5, %v113_v34 }
  0xe3   :  { %v118_v38 = vmul.f32 0.044715, %v108_v36  ;;  %v116_v50 = vmul.f32 0.5, %v108_v36 }
  0xe4   :  { %v121_v39 = vmul.f32 %v119_v37, %v113_v34 }
  0xe5   :  { %v120_v40 = vmul.f32 %v118_v38, %v108_v36 }
  0xe6   :  { %v123_v41 = vmul.f32 %v121_v39, %v113_v34 }
  0xe7   :  { %v122_v42 = vmul.f32 %v120_v40, %v108_v36 }
  0xe8   :  { %v125_v43 = vadd.f32 %v123_v41, %v113_v34 }
  0xe9   :  { %v124_v44 = vadd.f32 %v122_v42, %v108_v36 }
  0xea   :  { %v127_v45 = vmul.f32 0.7978846, %v125_v43 }
  0xeb   :  { %v126_v46 = vmul.f32 0.7978846, %v124_v44 }
  0xec   :  { %367 = vtanh.f32 %v127_v45 }
  0xed   :  { %369 = vtanh.f32 %v126_v46 }
  0xf6   :  { %v368_v47 = vpop.eup %367 }
  0xf7   :  { %v370_v48 = vpop.eup %369  ;;  %v131_v49 = vadd.f32 1.0, %v368_v47 }
  0xf8   :  { %v130_v51 = vadd.f32 1.0, %v370_v48 }
  0xf9   :  { %v133_v54 = vmul.f32 %v131_v49, %v117_v52 }
  0xfa   :  { %v132_v53 = vmul.f32 %v130_v51, %v116_v50 }
  0xfc   :  { %321 = vmatprep.mubr.f32.mxu1 %v132_v53 }
  0xfd   :  { %322 = vmatmul.mubr.f32.vlgmr.msra.gmra.mrb[0].mxu1 %v133_v54 }
 0x1d0   :  { %v323_v56 = vpop.f32.mrb[0].mxu1 }
 0x1d1   :  { %v229_v57 = vadd.f32 %v323_v56, %v253_v55  ;;  %v223_v58 = vpop.f32.mrb[1].mxu1 }
 0x1d2   :  { %v224_v59 = vadd.f32 %v253_v55, %v223_v58 }
 0x1d3   :  { %233 = vst.msk [vmem:[#allocation2 + $0x8] sm:$0xff] %vm34_vm0, %v229_v57 }
 0x1d4   :  { %232 = vst.msk [vmem:[#allocation2] sm:$0xff] %vm34_vm0, %v224_v59 }
 0x1d5   :  { %382 = shalt.err (!%p379_p4)
}
 0x1d6   :  { %s383_s15 = scalar_lea.hbm %s521_s5, 256 }
 0x1d7   :  { %p384_p5 = scmp.ne.s32.totalorder %s521_s5, %s383_s15  ;;  %p387_p6 = scmp.lt.u32.totalorder %s383_s15, %s521_s5 }
 0x1d9   :  { %p389_p7 = pnand %p387_p6, %p384_p5 }
 0x1db   :  { %392 = shalt.err (!%p389_p7)
}
 0x1dc   :  { %s396_s19 = smov 128   ;;  %s397_s20 = smov 8  }
 0x1dd   :  { %245 = dma.vmem_to_hbm [thread:$0]  %s240_s12, 256, %s521_s5, [#allocation3], %s396_s19, %s396_s19, %s397_s20  }
 0x1de   :  { %393 = dma.done.wait [#allocation3], 256  }
 0x1df   :  { %394 = vsyncadd [#allocation3], 4294967040 }
 0x1e0   :  { %249 = vsyncpa [#allocation3], 1 }

</bundles_post_ra>
